<compile_context>
chip_gen: v7x
topology: tpu7x:2x2x1
jax: 0.10.0
libtpu: 0.0.40
codegen_flags: <defaults>
</compile_context>

<pallas_src>
import math

import numpy as np
import jax
import jax.numpy as jnp
from jax.experimental import pallas as pl
from jax.experimental.pallas import tpu as pltpu


def make_seasonality_basis(target_length: int) -> np.ndarray:
    """Deterministic parameter construction mirroring _SeasonalityGenerator.__init__."""
    assert target_length >= 1
    half_minus_one = int(target_length / 2 - 1)  # may be 0 for target_length < 4
    t = np.arange(target_length, dtype=np.float32) / target_length * 2.0 * np.pi
    cos_vectors = [np.cos(t * i) for i in range(1, half_minus_one + 1)]
    sin_vectors = [np.sin(t * i) for i in range(1, half_minus_one + 1)]
    # torch.stack([...], dim=1).T -> rows are the basis vectors
    basis = np.stack(
        [np.ones(target_length, dtype=np.float32)] + cos_vectors + sin_vectors, axis=1
    ).T  # (num_basis, target_length)
    return basis.astype(np.float32)


def _matmul_kernel(x_ref, basis_ref, o_ref):
    # Batch tile @ resident basis on the MXU with f32 accumulation.
    # Operand cast (if any) happens here, riding free VPU slack; the epilogue
    # cast stays in f32 (v5e has no bf16 VPU path).
    x = x_ref[...]
    if x.dtype != basis_ref.dtype:          # static (trace-time) decision
        x = x.astype(basis_ref.dtype)
    o_ref[...] = jnp.dot(
        x, basis_ref[...], preferred_element_type=jnp.float32
    ).astype(o_ref.dtype)


class SeasonalityGenerator:
    """Pallas-backed equivalent of darts' _SeasonalityGenerator forward pass."""

    # Resident block-diagonal basis must stay comfortably small in VMEM.
    _MAX_PACKED_BASIS_BYTES = 2 << 20

    def __init__(self, target_length, *, compute_dtype=jnp.float32,
                 tile_rows=4096, min_pallas_batch=1024):
        self.target_length = int(target_length)
        self.compute_dtype = compute_dtype
        self.tile_rows = int(tile_rows)              # target rows per grid step
        # NOTE: the Pallas/XLA crossover should be measured per generation
        # (higher on v7x where HBM is 3.2 TB/s and fixed call cost looms larger).
        self.min_pallas_batch = int(min_pallas_batch)

        basis_np = make_seasonality_basis(self.target_length)   # (K, T) f32
        self.num_basis = basis_np.shape[0]

        # "Parameter" kept in f32 (like the torch module, requires_grad=False).
        self.basis = jnp.asarray(basis_np)                       # (K, T) f32
        self.basis_c = self.basis.astype(compute_dtype)          # matmul operand copy

        # Generalised lane packing: fold P = 128/gcd(T,128) batch rows into one
        # W = T*P lane-wide output row (W a multiple of 128) via a block-diagonal
        # basis, so output stores are full-width vst.  The (B,K)->(B/P, P*K)
        # repack and (B/P,W)->(B,T) unpack are contiguous row-major reshapes.
        T, K = self.target_length, self.num_basis
        self.pack = 0
        self.pack_width = 0
        self.basis_packed_c = None
        if T <= 128:
            g = math.gcd(T, 128)
            P = 128 // g
            W = T * P                                 # multiple of 128
            KP = P * K
            if KP * W * np.dtype(compute_dtype).itemsize <= self._MAX_PACKED_BASIS_BYTES:
                packed = np.zeros((KP, W), dtype=np.float32)
                for j in range(P):
                    packed[j * K:(j + 1) * K, j * T:(j + 1) * T] = basis_np
                self.pack = P
                self.pack_width = W
                self.basis_packed_c = jnp.asarray(packed).astype(compute_dtype)

    # -------------------------------------------------------------------------
    def __call__(self, x: jnp.ndarray) -> jnp.ndarray:
        B, K = x.shape
        assert K == self.num_basis, f"coefficient dim mismatch: {K} vs {self.num_basis}"
        out_dtype = x.dtype

        # Tiny batch: pallas_call launch/DMA fixed cost dwarfs the few KFLOPs;
        # let XLA fuse a plain matmul with the same operands / f32 accumulation.
        if B < self.min_pallas_batch:
            return jnp.matmul(
                x.astype(self.compute_dtype), self.basis_c,
                preferred_element_type=jnp.float32,
            ).astype(out_dtype)

        if self.pack:
            return self._forward_packed(x, out_dtype)
        # Fallback for T > 128 or an oversized packed basis: stores are masked
        # partial vst (acceptable only because this path is rare for N-BEATS horizons).
        return self._forward_tiled(x, out_dtype)

    # -- lane-dense packed path: output block last dim is a multiple of 128 ----
    def _forward_packed(self, x, out_dtype):
        B, K = x.shape
        P, T, W = self.pack, self.target_length, self.pack_width
        KP = P * K

        # Pad B up to a multiple of P (a few extra rows are far cheaper than
        # falling back to masked partial stores).
        Bp = ((B + P - 1) // P) * P
        if Bp != B:
            x = jnp.pad(x, ((0, Bp - B), (0, 0)))
        R = Bp // P
        x_packed = x.reshape(R, KP)          # contiguous row-major repack (free)

        in_b = np.dtype(x.dtype).itemsize
        out_b = np.dtype(out_dtype).itemsize
        basis_b = KP * W * np.dtype(self.compute_dtype).itemsize
        row_bytes = KP * in_b + W * out_b
        TR = self._choose_tile(R, row_bytes, basis_b, self.tile_rows)
        grid = (pl.cdiv(R, TR),)

        cost = pl.CostEstimate(
            flops=2 * R * KP * W, transcendentals=0,
            bytes_accessed=R * KP * in_b + R * W * out_b + basis_b)

        out_packed = pl.pallas_call(
            _matmul_kernel,
            out_shape=jax.ShapeDtypeStruct((R, W), out_dtype),
            grid=grid,
            in_specs=[
                pl.BlockSpec((TR, KP), lambda i: (i, 0)),    # batch tile
                pl.BlockSpec((KP, W), lambda i: (0, 0)),     # resident block-diag basis
            ],
            out_specs=pl.BlockSpec((TR, W), lambda i: (i, 0)),
            compiler_params=pltpu.CompilerParams(
                dimension_semantics=("parallel",),           # v7x: 2 TCs split the batch
            ),
            cost_estimate=cost,
        )(x_packed, self.basis_packed_c)

        out = out_packed.reshape(Bp, T)      # contiguous row-major unpack (free)
        if Bp != B:
            out = out[:B]
        return out

    # -- generic path (T > 128 or packed basis too large) ----------------------
    def _forward_tiled(self, x, out_dtype):
        B, K = x.shape
        T = self.target_length
        in_b = np.dtype(x.dtype).itemsize
        out_b = np.dtype(out_dtype).itemsize
        basis_b = K * T * np.dtype(self.compute_dtype).itemsize
        row_bytes = K * in_b + T * out_b
        TB = self._choose_tile(B, row_bytes, basis_b, self.tile_rows)
        grid = (pl.cdiv(B, TB),)

        cost = pl.CostEstimate(
            flops=2 * B * K * T, transcendentals=0,
            bytes_accessed=B * K * in_b + B * T * out_b + basis_b)

        # Note: partial last tiles feed padded garbage rows to the MXU but their
        # output rows are dropped on writeback -- fine for a pure matmul.
        return pl.pallas_call(
            _matmul_kernel,
            out_shape=jax.ShapeDtypeStruct((B, T), out_dtype),
            grid=grid,
            in_specs=[
                pl.BlockSpec((TB, K), lambda i: (i, 0)),
                pl.BlockSpec((K, T), lambda i: (0, 0)),
            ],
            out_specs=pl.BlockSpec((TB, T), lambda i: (i, 0)),
            compiler_params=pltpu.CompilerParams(
                dimension_semantics=("parallel",),
            ),
            cost_estimate=cost,
        )(x, self.basis_c)

    # -------------------------------------------------------------------------
    @staticmethod
    def _choose_tile(total_rows: int, row_bytes: int, resident_bytes: int,
                     target_rows: int) -> int:
        """Rows per grid step.

        Targets a few-MB tile (per-step overhead becomes noise), capped so the
        double-buffered in+out working set fits v7x's 32 MiB scoped-VMEM default
        with headroom, while keeping >= 2 grid steps (both v7x TensorCores busy)
        and >= 8 steps on large batches (input/output DMA overlap).
        """
        VMEM_BUDGET = 12 << 20
        MIN_STEP_ROWS = 512
        MIN_STEPS = 8

        budget = max(VMEM_BUDGET - 2 * resident_bytes, 1 << 20)
        max_vmem_rows = max(16, (budget // (2 * row_bytes)) // 16 * 16)
        tile = min(int(target_rows), max_vmem_rows, total_rows)

        # Keep >= MIN_STEPS pipeline steps when that still leaves non-trivial tiles.
        per_step = -(-total_rows // MIN_STEPS)          # ceil division
        if per_step >= MIN_STEP_ROWS:
            tile = min(tile, max(MIN_STEP_ROWS, (per_step // 16) * 16))

        # Always >= 2 steps when there is enough work (v7x: both cores get work).
        if total_rows >= 32:
            tile = min(tile, max(16, (total_rows // 2 // 16) * 16))

        tile = max(16, (tile // 16) * 16)               # sublane-friendly (f32 & bf16)
        return min(tile, total_rows)


if __name__ == "__main__":
    target_length = 16                        # -> num_basis = 1 + 2*7 = 15
    num_basis = 1 + 2 * int(target_length / 2 - 1)
    batch = 2048                              # large enough that the packed Pallas path
                                              # (>= 2 grid steps), not launch overhead,
                                              # is what is exercised

    key = jax.random.PRNGKey(0)
    x = jax.random.normal(key, (batch, num_basis), dtype=jnp.float32)

    # Default path: f32 operands (torch semantics), lane-dense packed output.
    gen = SeasonalityGenerator(target_length)
    out = jax.block_until_ready(gen(x))
    assert out.shape == (batch, target_length)

    # float64 reference; tolerance covers default (non-HIGHEST) MXU f32 matmul
    # precision across TPU generations.  A packing/indexing bug would be O(1) off.
    basis64 = np.asarray(gen.basis, dtype=np.float64)
    ref = np.asarray(x, dtype=np.float64) @ basis64
    np.testing.assert_allclose(np.asarray(out, dtype=np.float64), ref,
                               rtol=5e-2, atol=5e-2)

    # B not a multiple of the lane pack P -> exercises the pad-and-slice path
    # plus a partial last grid tile.
    x_odd = jax.random.normal(jax.random.PRNGKey(1), (batch + 5, num_basis),
                              dtype=jnp.float32)
    out_odd = jax.block_until_ready(gen(x_odd))
    ref_odd = np.asarray(x_odd, dtype=np.float64) @ basis64
    np.testing.assert_allclose(np.asarray(out_odd, dtype=np.float64), ref_odd,
                               rtol=5e-2, atol=5e-2)

    # Opt-in bf16 operands: in-kernel cast, f32 accumulation.  Compare against a
    # bf16-quantized reference so only accumulation-order noise remains.
    gen_bf16 = SeasonalityGenerator(target_length, compute_dtype=jnp.bfloat16)
    out_bf16 = jax.block_until_ready(gen_bf16(x))
    x_bf = np.asarray(x.astype(jnp.bfloat16).astype(jnp.float32), dtype=np.float64)
    b_bf = np.asarray(gen_bf16.basis_c.astype(jnp.float32), dtype=np.float64)
    np.testing.assert_allclose(np.asarray(out_bf16, dtype=np.float64), x_bf @ b_bf,
                               rtol=1e-2, atol=1e-2)

    # Tiny batch takes the fused-XLA fast path (a kernel launch would be pure overhead).
    x_small = jax.random.normal(jax.random.PRNGKey(2), (8, num_basis),
                                dtype=jnp.float32)
    out_small = jax.block_until_ready(gen(x_small))
    ref_small = np.asarray(x_small, dtype=np.float64) @ basis64
    np.testing.assert_allclose(np.asarray(out_small, dtype=np.float64), ref_small,
                               rtol=5e-2, atol=5e-2)

    print("KERNEL_OK")
</pallas_src>

<mosaic_0001>
module attributes {stable_mosaic.version = 11 : i64} {
  func.func @_matmul_kernel(%arg0: i32, %arg1: memref<128x120xf32, #tpu.memory_space<vmem>>, %arg2: memref<120x128xf32, #tpu.memory_space<vmem>>, %arg3: memref<128x128xf32, #tpu.memory_space<vmem>>) attributes {dimension_semantics = [#tpu.dimension_semantics<parallel>], iteration_bounds = array<i64: 2>, scalar_prefetch = 0 : i64, scratch_operands = 0 : i64, tpu.core_type = #tpu.core_type<tc>, window_params = [{transform_indices = @transform_0, window_bounds = array<i64: 128, 120>}, {pipeline_mode = #tpu.pipeline_mode<synchronous>, transform_indices = @transform_1, window_bounds = array<i64: 120, 128>}, {transform_indices = @transform_2, window_bounds = array<i64: 128, 128>}]} {
    %c0 = arith.constant 0 : index
    %c0_0 = arith.constant 0 : index
    %0 = vector.load %arg1[%c0, %c0_0] : memref<128x120xf32, #tpu.memory_space<vmem>>, vector<128x120xf32>
    %c0_1 = arith.constant 0 : index
    %c0_2 = arith.constant 0 : index
    %1 = vector.load %arg2[%c0_1, %c0_2] : memref<120x128xf32, #tpu.memory_space<vmem>>, vector<120x128xf32>
    %cst = arith.constant dense<0.000000e+00> : vector<128x128xf32>
    %2 = tpu.matmul %0, %1, %cst {dimension_numbers = #tpu.dot_dimension_numbers<[1], [0], [0], [1], [0, 0, 1, 1], [], []>} : vector<128x120xf32>, vector<120x128xf32>, vector<128x128xf32> -> vector<128x128xf32>
    %c0_3 = arith.constant 0 : index
    %c0_4 = arith.constant 0 : index
    %3 = vector.load %arg3[%c0_3, %c0_4] : memref<128x128xf32, #tpu.memory_space<vmem>>, vector<128x128xf32>
    tpu.vector_store %arg3[%c0_3, %c0_4], %2 {strides = array<i32>} : memref<128x128xf32, #tpu.memory_space<vmem>>, vector<128x128xf32>,
    return
  }
  func.func @transform_0(%arg0: i32) -> (i32, i32) {
    %c0_i32 = arith.constant 0 : i32
    %c0_i32_0 = arith.constant 0 : i32
    return %arg0, %c0_i32 : i32, i32
  }
  func.func @transform_1(%arg0: i32) -> (i32, i32) {
    %c0_i32 = arith.constant 0 : i32
    %c0_i32_0 = arith.constant 0 : i32
    %c0_i32_1 = arith.constant 0 : i32
    return %c0_i32, %c0_i32_0 : i32, i32
  }
  func.func @transform_2(%arg0: i32) -> (i32, i32) {
    %c0_i32 = arith.constant 0 : i32
    %c0_i32_0 = arith.constant 0 : i32
    return %arg0, %c0_i32 : i32, i32
  }
}

</mosaic_0001>

<bundles_post_ra>
// kernel: tpu_custom_call.1
= control target key start
LH: loop header
LB: loop body
LE: loop exit
PB: predicated region body
PF: predicated region fallthrough
CT: control target
= control target key end

     0   :  { %7 = vsyncpa [#allocation3], 0  ;;  %s947_s0 = inlined_call_operand.vmem [shape: f32[256,120], index: 0, kind: input, shape index: {}]   ;;  %s948_s1 = inlined_call_operand.vmem [shape: f32[120,128], index: 1, kind: input, shape index: {}]   ;;  %s949_s2 = inlined_call_operand.hbm [shape: f32[256,128], index: 2, kind: output, shape index: {}]  }
   0x1   :  { %9 = vsyncpa [#allocation3 + $0x1], 0  ;;  %s743_s9 = smov 0   ;;  %s745_s10 = smov 0  }
   0x2   :  { %s747_s11 = smov 0   ;;  %s749_s12 = smov 0  }
   0x3 LB: > { %s764_s13 = sadd.s32 4294967295, %s723_s12   ;;  %s462_s14 = sadd.s32 4294967294, %s723_s12   ;;  %s723_s12 = sphi %s749_s12, %s955_s12   ;;  %s719_s11 = sphi %s747_s11, %s954_s11   ;;  %s715_s10 = sphi %s745_s10, %s953_s10   ;;  %s711_s9 = sphi %s743_s9, %s952_s9  }
   0x4   : > { %s768_s15 = sadd.s32 1, %s723_s12   ;;  %s69_s16 = sadd.s32 1, %s719_s11 }
   0x5   : > { %s66_s17 = ssub.s32 %s723_s12, %s768_s15  ;;  %p79_p0 = scmp.ne.s32.totalorder %s719_s11, %s715_s10 }
   0x6   : > { %p67_p1 = scmp.eq.s32.totalorder %s66_s17, 0  ;;  %p80_p2 = scmp.eq.s32.totalorder %s764_s13, 1 }
   0x7   : > { %p85_p3 = scmp.ne.s32.totalorder %s715_s10, %s711_s9  ;;  %p86_p4 = scmp.eq.s32.totalorder %s462_s14, 1 }
   0x8   : > { %s779_s18 = scalar_select %p67_p1, %s719_s11, %s69_s16  }
   0x9   : > { %p781_p5 = por %p80_p2, %p79_p0  ;;  %p785_p6 = por %p86_p4, %p85_p3 }
   0xa   : > { %p465_p7 = scmp.ge.s32.totalorder %s723_s12, 1  ;;  %p116_p8 = scmp.lt.s32.totalorder %s723_s12, 3 }
   0xc   : > { %p117_p9 = pnand %p465_p7, %p116_p8 }
   0xd   : > { %v161_v0 = vld [vmem:[%s948_s1] sm:$0xff] (!%p117_p9)  ;;  %v162_v1 = vld [vmem:[%s948_s1 + $0x8] sm:$0xff] (!%p117_p9)  ;;  %v163_v2 = vld [vmem:[%s948_s1 + $0x10] sm:$0xff] (!%p117_p9)  ;;  %s467_s27 = sshll.u32 (!%p117_p9), %s764_s13, 4  ;;  %vm176_vm0 = vcmask (!%p117_p9), 982016   ;;  %s135_s14 = sand.u32 (!%p117_p9), 1, %s715_s10  }
   0xe   : > { %120 = sbr.rel (%p117_p9) target bundleno = 287 (0x11f), region = 28  ;;  %v576_v3 = vpack.c.bf16 (!%p117_p9), %v162_v1, %v161_v0  ;;  %v164_v4 = vld [vmem:[%s948_s1 + $0x18] sm:$0xff] (!%p117_p9)  ;;  %p139_p10 = scmp.lt.s32.totalorder (!%p117_p9), %s467_s27, 31  ;;  %v165_v6 = vld [vmem:[%s948_s1 + $0x20] sm:$0xff] (!%p117_p9)  ;;  %v166_v7 = vld [vmem:[%s948_s1 + $0x28] sm:$0xff] (!%p117_p9) }
   0xf   : > { %v580_v5 = vpack.c.bf16 (!%p117_p9), %v164_v4, %v163_v2  ;;  %v584_v8 = vpack.c.bf16 (!%p117_p9), %v166_v7, %v165_v6  ;;  %v167_v9 = vld [vmem:[%s948_s1 + $0x30] sm:$0xff] (!%p117_p9)  ;;  %v168_v10 = vld [vmem:[%s948_s1 + $0x38] sm:$0xff] (!%p117_p9)  ;;  %v169_v14 = vld [vmem:[%s948_s1 + $0x40] sm:$0xff] (!%p117_p9)  ;;  %s466_s16 = sshll.u32 (!%p117_p9), %s135_s14, 7  ;;  %s490_s21 = sshll.u32 (!%p117_p9), %s764_s13, 11 }
  0x10   : > { %577 = vmatprep.subr.bf16.mxu0 (!%p117_p9), %v576_v3  ;;  %604 = vmatprep.subr.bf16.mxu1 (!%p117_p9), %v576_v3  ;;  %v588_v13 = vpack.c.bf16 (!%p117_p9), %v168_v10, %v167_v9  ;;  %v170_v15 = vld [vmem:[%s948_s1 + $0x48] sm:$0xff] (!%p117_p9)  ;;  %v171_v17 = vld [vmem:[%s948_s1 + $0x50] sm:$0xff] (!%p117_p9)  ;;  %v172_v18 = vld [vmem:[%s948_s1 + $0x58] sm:$0xff] (!%p117_p9)  ;;  %s877_s17 = scalar_lea.vmem (!%p117_p9), [#allocation2], %s466_s16  ;;  %s896_s25 = scalar_lea.hbm (!%p117_p9), %s949_s2, %s490_s21 }
  0x11   : > { %579 = vmatpush3.bf16.msra.mxu0 (!%p117_p9), %v576_v3  ;;  %612 = vmatpush3.bf16.msra.mxu1 (!%p117_p9), %v576_v3  ;;  %v592_v16 = vpack.c.bf16 (!%p117_p9), %v170_v15, %v169_v14  ;;  %v596_v19 = vpack.c.bf16 (!%p117_p9), %v172_v18, %v171_v17  ;;  %v173_v20 = vld [vmem:[%s948_s1 + $0x60] sm:$0xff] (!%p117_p9)  ;;  %v174_v21 = vld [vmem:[%s948_s1 + $0x68] sm:$0xff] (!%p117_p9)  ;;  %v175_v23 = vld [vmem:[%s948_s1 + $0x70] sm:$0xff] (!%p117_p9)  ;;  %s906_s13 = scalar_lea.sflag (!%p117_p9), [#allocation3], %s135_s14 }
  0x12   : > { %581 = vmatprep.subr.bf16.mxu0 (!%p117_p9), %v580_v5  ;;  %605 = vmatprep.subr.bf16.mxu1 (!%p117_p9), %v580_v5  ;;  %v600_v22 = vpack.c.bf16 (!%p117_p9), %v174_v21, %v173_v20 }
  0x15   : > { %s957_s27 = smov (!%p139_p10, %s467_s27), 31  ;;  %583 = vmatpush3.bf16.msra.mxu0 %v580_v5  ;;  %613 = vmatpush3.bf16.msra.mxu1 %v580_v5 }
  0x16   : > { %s468_s6 = sshll.u32 %s957_s27, 3  ;;  %585 = vmatprep.subr.bf16.mxu0 %v584_v8  ;;  %606 = vmatprep.subr.bf16.mxu1 %v584_v8  ;;  %s725_s27 = smov [#allocation2]  }
  0x17   : > { %s819_s22 = scalar_lea.vmem %s947_s0, %s468_s6  ;;  %s665_s28 = sshll.u32 %s725_s27, 4  ;;  %s666_s28 = int_to_ptr.vmem [resolvable:$false] %s665_s28 }
  0x18   : > { %v145_v11 = vld [vmem:[%s819_s22] sm:$0xff]  ;;  %v146_v24 = vld [vmem:[%s819_s22 + $0x8] sm:$0xff]  ;;  %v147_v26 = vld [vmem:[%s819_s22 + $0x10] sm:$0xff]  ;;  %s667_s29 = scalar_lea.vmem %s666_s28, 4096 }
  0x19   : > { %v153_v12 = vld [vmem:[%s819_s22 + $0x40] sm:$0xff]  ;;  %552 = vmatprep.mubr.msk.f32.mxu0 %vm176_vm0, %v145_v11  ;;  %587 = vmatpush3.bf16.msra.mxu0 %v584_v8  ;;  %v154_v25 = vld [vmem:[%s819_s22 + $0x48] sm:$0xff]  ;;  %v155_v27 = vld [vmem:[%s819_s22 + $0x50] sm:$0xff] }
  0x1a   : > { %564 = vmatprep.mubr.msk.f32.mxu1 %vm176_vm0, %v153_v12  ;;  %614 = vmatpush3.bf16.msra.mxu1 %v584_v8  ;;  %v148_v28 = vld [vmem:[%s819_s22 + $0x18] sm:$0xff]  ;;  %v149_v30 = vld [vmem:[%s819_s22 + $0x20] sm:$0xff]  ;;  %v150_v32 = vld [vmem:[%s819_s22 + $0x28] sm:$0xff] }
  0x1b   : > { %589 = vmatprep.subr.bf16.mxu0 %v588_v13  ;;  %607 = vmatprep.subr.bf16.mxu1 %v588_v13  ;;  %v156_v29 = vld [vmem:[%s819_s22 + $0x58] sm:$0xff]  ;;  %v157_v31 = vld [vmem:[%s819_s22 + $0x60] sm:$0xff]  ;;  %v158_v33 = vld [vmem:[%s819_s22 + $0x68] sm:$0xff] }
  0x1c   : > { %v151_v34 = vld [vmem:[%s819_s22 + $0x30] sm:$0xff]  ;;  %v152_v36 = vld [vmem:[%s819_s22 + $0x38] sm:$0xff] }
  0x1d   : > { %591 = vmatpush3.bf16.msra.mxu0 %v588_v13  ;;  %v159_v35 = vld [vmem:[%s819_s22 + $0x70] sm:$0xff]  ;;  %v160_v37 = vld [vmem:[%s819_s22 + $0x78] sm:$0xff]  ;;  %s400_s22 = sshll.u32 %s877_s17, 4  ;;  %s898_s22 = int_to_ptr.vmem [resolvable:$true] %s400_s22 }
  0x1e   : > { %615 = vmatpush3.bf16.msra.mxu1 %v588_v13  ;;  %593 = vmatprep.subr.bf16.mxu0 %v592_v16  ;;  %s661_s26 = scalar_lea.vmem %s898_s22, 2048  ;;  %p668_p0 = scmp.lt.s32.totalorder %s898_s22, %s666_s28 }
  0x1f   : > { %608 = vmatprep.subr.bf16.mxu1 %v592_v16  ;;  %p662_p11 = scmp.ne.s32.totalorder %s898_s22, %s661_s26  ;;  %p669_p1 = scmp.lt.s32.totalorder %s667_s29, %s661_s26 }
  0x21   : > { %595 = vmatpush3.bf16.msra.mxu0 %v592_v16  ;;  %p663_p12 = pnand %p662_p11, %p781_p5  ;;  %p670_p2 = por %p669_p1, %p668_p0 }
  0x22   : > { %616 = vmatpush3.bf16.msra.mxu1 %v592_v16  ;;  %597 = vmatprep.subr.bf16.mxu0 %v596_v19 }
  0x23   : > { %609 = vmatprep.subr.bf16.mxu1 %v596_v19  ;;  %p664_p13 = pneg %p663_p12 }
  0x25   : > { %599 = vmatpush3.bf16.msra.mxu0 %v596_v19  ;;  %p671_p3 = pnand %p670_p2, %p664_p13 }
  0x26   : > { %617 = vmatpush3.bf16.msra.mxu1 %v596_v19  ;;  %601 = vmatprep.subr.bf16.mxu0 %v600_v22 }
  0x27   : > { %610 = vmatprep.subr.bf16.mxu1 %v600_v22 }
  0x29   : > { %603 = vmatpush3.bf16.msra.mxu0 %v600_v22 }
  0x2a   : > { %618 = vmatpush3.bf16.msra.mxu1 %v600_v22  ;;  %550 = vmatprep.subr.mxu0 %v175_v23 }
  0x2b   : > { %611 = vmatprep.subr.mxu1 %v175_v23 }
  0x2d   : > { %551 = vmatpush3.msra.mxu0 %v175_v23 }
  0x2e   : > { %619 = vmatpush3.msra.mxu1 %v175_v23  ;;  %553 = vmatmul.mubr.msk.f32.vlgmr.msra.gmra.mrb[0].mxu0 %vm176_vm0, %v146_v24 }
  0x2f   : > { %565 = vmatmul.mubr.msk.f32.vlgmr.msra.gmra.mrb[0].mxu1 %vm176_vm0, %v154_v25  ;;  %555 = vmatprep.mubr.msk.f32.mxu0 %vm176_vm0, %v147_v26 }
  0x30   : > { %567 = vmatprep.mubr.msk.f32.mxu1 %vm176_vm0, %v155_v27 }
  0x32   : > { %556 = vmatmul.mubr.msk.f32.gmra.mrb[2].mxu0 %vm176_vm0, %v148_v28 }
  0x33   : > { %568 = vmatmul.mubr.msk.f32.gmra.mrb[2].mxu1 %vm176_vm0, %v156_v29  ;;  %558 = vmatprep.mubr.msk.f32.mxu0 %vm176_vm0, %v149_v30 }
  0x34   : > { %570 = vmatprep.mubr.msk.f32.mxu1 %vm176_vm0, %v157_v31 }
  0x36   : > { %559 = vmatmul.mubr.msk.f32.gmra.mrb[4].mxu0 %vm176_vm0, %v150_v32 }
  0x37   : > { %571 = vmatmul.mubr.msk.f32.gmra.mrb[4].mxu1 %vm176_vm0, %v158_v33  ;;  %561 = vmatprep.mubr.msk.f32.mxu0 %vm176_vm0, %v151_v34 }
  0x38   : > { %573 = vmatprep.mubr.msk.f32.mxu1 %vm176_vm0, %v159_v35 }
  0x3a   : > { %562 = vmatmul.mubr.msk.f32.gmra.mrb[6].mxu0 %vm176_vm0, %v152_v36 }
  0x3b   : > { %574 = vmatmul.mubr.msk.f32.gmra.mrb[6].mxu1 %vm176_vm0, %v160_v37 }
 0x101   : > { %v554_v38 = vpop.f32.mrb[0].mxu0 }
 0x102   : > { %v566_v39 = vpop.f32.mrb[0].mxu1  ;;  %371 = vst [vmem:[%s877_s17 + $0x8] sm:$0xff] %v554_v38  ;;  %v291_v40 = vpop.f32.mrb[1].mxu0 }
 0x103   : > { %379 = vst [vmem:[%s877_s17 + $0x48] sm:$0xff] %v566_v39  ;;  %v331_v41 = vpop.f32.mrb[1].mxu1  ;;  %370 = vst [vmem:[%s877_s17] sm:$0xff] %v291_v40 }
 0x104   : > { %378 = vst [vmem:[%s877_s17 + $0x40] sm:$0xff] %v331_v41 }
 0x105   : > { %v557_v42 = vpop.f32.mrb[2].mxu0 }
 0x106   : > { %v569_v43 = vpop.f32.mrb[2].mxu1  ;;  %373 = vst [vmem:[%s877_s17 + $0x18] sm:$0xff] %v557_v42  ;;  %v301_v44 = vpop.f32.mrb[3].mxu0 }
 0x107   : > { %381 = vst [vmem:[%s877_s17 + $0x58] sm:$0xff] %v569_v43  ;;  %v341_v45 = vpop.f32.mrb[3].mxu1  ;;  %372 = vst [vmem:[%s877_s17 + $0x10] sm:$0xff] %v301_v44 }
 0x108   : > { %380 = vst [vmem:[%s877_s17 + $0x50] sm:$0xff] %v341_v45 }
 0x109   : > { %v560_v46 = vpop.f32.mrb[4].mxu0 }
 0x10a   : > { %v572_v47 = vpop.f32.mrb[4].mxu1  ;;  %375 = vst [vmem:[%s877_s17 + $0x28] sm:$0xff] %v560_v46  ;;  %v311_v48 = vpop.f32.mrb[5].mxu0 }
 0x10b   : > { %383 = vst [vmem:[%s877_s17 + $0x68] sm:$0xff] %v572_v47  ;;  %v351_v49 = vpop.f32.mrb[5].mxu1  ;;  %374 = vst [vmem:[%s877_s17 + $0x20] sm:$0xff] %v311_v48 }
 0x10c   : > { %382 = vst [vmem:[%s877_s17 + $0x60] sm:$0xff] %v351_v49 }
 0x10d   : > { %v563_v50 = vpop.f32.mrb[6].mxu0 }
 0x10e   : > { %v575_v51 = vpop.f32.mrb[6].mxu1  ;;  %377 = vst [vmem:[%s877_s17 + $0x38] sm:$0xff] %v563_v50  ;;  %v321_v52 = vpop.f32.mrb[7].mxu0 }
 0x10f   : > { %385 = vst [vmem:[%s877_s17 + $0x78] sm:$0xff] %v575_v51  ;;  %v361_v53 = vpop.f32.mrb[7].mxu1  ;;  %376 = vst [vmem:[%s877_s17 + $0x30] sm:$0xff] %v321_v52 }
 0x110   : > { %384 = vst [vmem:[%s877_s17 + $0x70] sm:$0xff] %v361_v53 }
 0x111   : > { %674 = shalt.err (!%p671_p3)
}
 0x112   : > { %s675_s30 = scalar_lea.hbm %s896_s25, 2048  ;;  %s679_s5 = scalar_lea.hbm %s949_s2, 4096 }
 0x113   : > { %p676_p4 = scmp.ne.s32.totalorder %s896_s25, %s675_s30  ;;  %p680_p9 = scmp.lt.u32.totalorder %s896_s25, %s949_s2 }
 0x114   : > { %p681_p10 = scmp.lt.u32.totalorder %s679_s5, %s675_s30  ;;  %p683_p12 = scmp.lt.u32.totalorder %s675_s30, %s896_s25 }
 0x115   : > { %p677_p7 = pnand %p676_p4, %p781_p5 }
 0x116   : > { %p682_p11 = por %p681_p10, %p680_p9 }
 0x117   : > { %p678_p8 = pneg %p677_p7 }
 0x118   : > { %p684_p13 = por %p683_p12, %p682_p11 }
 0x11a   : > { %p685_p0 = pnand %p684_p13, %p678_p8 }
 0x11c   : > { %688 = shalt.err (!%p685_p0)
}
 0x11d   : > { %s726_s8 = smov 128   ;;  %s727_s14 = smov 8  }
 0x11e   : > { %620 = dma.vmem_to_hbm [thread:$0]  (%p781_p5), %s898_s22, 2048, %s896_s25, %s906_s13, %s726_s8, %s726_s8, %s727_s14  }
 0x11f PF: > { %p626_p1 = scmp.ge.s32.totalorder %s723_s12, 2  ;;  %s415_s16 = sand.u32 1, %s711_s9  }
 0x120   : > { %s416_s17 = scalar_lea.sflag [#allocation3], %s415_s16 }
 0x121   : > { %p623_p2 = pnand %p626_p1, %p785_p6 }
 0x123   : > { %706 = dma.done.wait (!%p623_p2), %s416_s17, 2048  }
 0x124   : > { %708 = vsyncadd (!%p623_p2), %s416_s17, 4294965248  ;;  %p12_p3 = scmp.ge.s32.totalorder %s768_s15, 4   ;;  %s952_s9 = smov %s715_s10 }
 0x125   : > { %s953_s10 = smov %s719_s11  ;;  %s954_s11 = smov %s779_s18 }
 0x126   : > { %s955_s12 = smov %s768_s15  ;;  %14 = sbr.rel (!%p12_p3) target bundleno = 3 (0x3), region = 63 }
 0x12d   :  { %421 = vsyncpa [#allocation3], 1 }
 0x12e   :  { %423 = vsyncpa [#allocation3 + $0x1], 1 }

</bundles_post_ra>
